<compile_context>
chip_gen: v6e
topology: v6e:2x2x1
jax: 0.10.0
libtpu: 0.0.40
codegen_flags: <defaults>
</compile_context>

<pallas_src>
import functools

import jax
import jax.numpy as jnp
from jax.experimental import pallas as pl
from jax.experimental.pallas import tpu as pltpu

LN_EPS = 1e-5
L2_EPS = 1e-12


def _round_up(x, m):
    return ((x + m - 1) // m) * m


# ----------------------------------------------------------------------------
# VMEM budget / tiling plan
# ----------------------------------------------------------------------------
def _vmem_limit_bytes():
    """Generation-aware scoped-VMEM budget.

    ~48 MiB on v7x (64 MiB physical), ~96 MiB on v5e/v6e (128 MiB physical).
    Conservative (v7x-sized) fallback if the hardware query is unavailable.
    """
    phys = 64 * 1024 * 1024
    try:
        cap = getattr(pltpu.get_tpu_info(), "vmem_capacity_bytes", None)
        if cap:
            phys = int(cap)
    except Exception:
        pass
    return min((phys * 3) // 4, 100 * 1024 * 1024)


def _plan_tiles(B, E, feats, vmem_limit, max_chunk_rows=None):
    """Byte-budget-driven batch-tile / per-modality L-chunk sizes."""
    n_mod = len(feats)
    # ~60% of the scoped VMEM for the double-buffered feature blocks; the rest
    # is headroom for the pooled output blocks and compiler scratch.
    per_buf = max(1, int(vmem_limit * 0.6) // (2 * n_mod))
    itemsize_max = max(int(f.dtype.itemsize) for f in feats)

    if B < 16:
        bt, n_btiles = B, 1                      # single tile; dim 0 of a 3-D
    else:                                        # block is not (8,128)-bound
        bt = _round_up(pl.cdiv(B, 2), 8)         # >=2 tiles -> both v7x TCs
        max_bt = max(8, ((per_buf // (8 * E * itemsize_max)) // 8) * 8)
        bt = max(8, min(bt, max_bt))
        n_btiles = pl.cdiv(B, bt)

    chunks, n_chunks = [], []
    for f in feats:
        L = int(f.shape[1])
        rows = per_buf // max(1, bt * E * int(f.dtype.itemsize))
        if max_chunk_rows is not None:
            rows = min(rows, int(max_chunk_rows))
        if rows >= L or L <= 8:
            c = L                                # full dim (exempt from /8 rule)
        else:
            c = max(8, (rows // 8) * 8)          # multiple of 8 sublane rows
        chunks.append(int(c))
        n_chunks.append(int(pl.cdiv(L, c)))
    return bt, n_btiles, chunks, n_chunks


# ----------------------------------------------------------------------------
# Launch 1: streamed mean-pool over L (memory-bound)
# ----------------------------------------------------------------------------
def _pool_kernel(*refs, seq_lens, chunks, n_chunks):
    n_mod = len(seq_lens)
    feat_refs = refs[:n_mod]
    out_refs = refs[n_mod:2 * n_mod]
    l = pl.program_id(1)

    @pl.when(l == 0)
    def _init():
        for out in out_refs:
            out[...] = jnp.zeros_like(out)

    for m in range(n_mod):
        L_m, c_m, n_cm = seq_lens[m], chunks[m], n_chunks[m]

        def _accumulate(feat=feat_refs[m], out=out_refs[m], L_m=L_m, c_m=c_m):
            x = feat[...]
            if x.dtype != jnp.float32:
                x = x.astype(jnp.float32)        # bf16 streaming ok, f32 accum
            if L_m % c_m != 0:
                # Last chunk is partial: zero the unspecified tail rows.
                limit = L_m - l * c_m
                pos = jax.lax.broadcasted_iota(jnp.int32, (c_m, x.shape[-1]), 0)
                x = jnp.where((pos < limit)[None, :, :], x, 0.0)
            out[...] += jnp.sum(x, axis=1)

        # Short modality: once its stream is exhausted the (clamped) index map
        # keeps the same block (no re-DMA) and the add is skipped entirely.
        pl.when(l < n_cm)(_accumulate)

        def _scale(out=out_refs[m], inv=1.0 / L_m):
            out[...] = out[...] * jnp.float32(inv)   # sum -> mean

        pl.when(l == n_cm - 1)(_scale)


# ----------------------------------------------------------------------------
# Launch 2: projection heads + similarity + symmetric InfoNCE loss
# ----------------------------------------------------------------------------
def _head(pooled, w1, b1, gamma, beta, w2, b2, gelu_approx):
    """Linear -> LayerNorm -> GELU -> Dropout(identity) -> Linear -> L2-norm."""
    # bf16 MXU operands, f32 accumulation.
    h = jnp.dot(pooled.astype(jnp.bfloat16), w1,
                preferred_element_type=jnp.float32) + b1
    mu = jnp.mean(h, axis=-1, keepdims=True)
    var = jnp.mean((h - mu) * (h - mu), axis=-1, keepdims=True)
    h = (h - mu) * jax.lax.rsqrt(var + LN_EPS)
    h = h * gamma + beta
    # Exact erf GELU (matches torch nn.GELU()).
    h = jax.nn.gelu(h, approximate=gelu_approx)
    # TODO(synk): training-mode dropout (p=0.1) not implemented (eval=identity).
    h = jnp.dot(h.astype(jnp.bfloat16), w2,
                preferred_element_type=jnp.float32) + b2
    # F.normalize(dim=-1); divide moved onto the EUP via approx reciprocal.
    norm = jnp.sqrt(jnp.sum(h * h, axis=-1, keepdims=True))
    return h * pl.reciprocal(jnp.maximum(norm, L2_EPS), approx=True)


def _heads_kernel(*refs, n_mod, gelu_approx):
    idx = 0
    temp_ref = refs[idx]; idx += 1
    pooled_refs = refs[idx:idx + n_mod]; idx += n_mod
    weight_refs = []
    for _ in range(n_mod):
        weight_refs.append(refs[idx:idx + 6]); idx += 6
    proj_refs = refs[idx:idx + n_mod]; idx += n_mod
    sim_ref = refs[idx]; idx += 1
    loss_ref = refs[idx]

    projs = []
    for m in range(n_mod):
        w1, b1, gamma, beta, w2, b2 = (r[...] for r in weight_refs[m])
        proj = _head(pooled_refs[m][...], w1, b1, gamma, beta, w2, b2,
                     gelu_approx)
        proj_refs[m][...] = proj
        projs.append(proj)

    vp, tp = projs[0], projs[1]
    inv_temp = 1.0 / temp_ref[0, 0]                       # scalar SMEM read
    # sim[i, j] = <vp_i, tp_j> / temperature   (bf16 MXU, f32 accumulate)
    sim = jax.lax.dot_general(
        vp.astype(jnp.bfloat16), tp.astype(jnp.bfloat16),
        (((1,), (1,)), ((), ())),
        preferred_element_type=jnp.float32) * inv_temp
    sim_ref[...] = sim

    bsz = sim.shape[0]
    row = jax.lax.broadcasted_iota(jnp.int32, (bsz, bsz), 0)
    col = jax.lax.broadcasted_iota(jnp.int32, (bsz, bsz), 1)
    # v->t: logsumexp over columns.
    m_r = jnp.max(sim, axis=-1, keepdims=True)
    lse_r = jnp.log(jnp.sum(jnp.exp(sim - m_r), axis=-1, keepdims=True)) + m_r
    # t->v: logsumexp over rows (no sim.T transpose needed).
    m_c = jnp.max(sim, axis=0, keepdims=True)
    lse_c = jnp.log(jnp.sum(jnp.exp(sim - m_c), axis=0, keepdims=True)) + m_c
    # Diagonal extracted once (diag(sim) == diag(sim.T)).
    sum_diag = jnp.sum(jnp.where(row == col, sim, 0.0))
    loss_ref[0, 0] = ((0.5 * (jnp.sum(lse_r) + jnp.sum(lse_c)) - sum_diag)
                      * jnp.float32(1.0 / bsz))


# ----------------------------------------------------------------------------
# Module wrapper
# ----------------------------------------------------------------------------
def init_params(key, embedding_dim, projection_dim):
    """Deterministic head parameters; MXU-facing matrices pre-cast to bf16
    once here (not per forward call)."""
    params = {}
    for name in ("visual", "text", "audio"):
        key, k1, k2, k3, k4 = jax.random.split(key, 5)
        params[name] = {
            "w1": (jax.random.normal(k1, (embedding_dim, projection_dim),
                                     jnp.float32) * 0.02).astype(jnp.bfloat16),
            "b1": jax.random.normal(k2, (1, projection_dim), jnp.float32) * 0.01,
            "gamma": jnp.ones((1, projection_dim), jnp.float32),
            "beta": jnp.zeros((1, projection_dim), jnp.float32),
            "w2": (jax.random.normal(k3, (projection_dim, projection_dim),
                                     jnp.float32) * 0.02).astype(jnp.bfloat16),
            "b2": jax.random.normal(k4, (1, projection_dim), jnp.float32) * 0.01,
        }
    return params


def cross_modal_alignment_forward(params, visual_features, text_features,
                                  audio_features=None, temperature=0.07,
                                  return_projections=True,
                                  max_chunk_rows=None, gelu_approx=False):
    names = ["visual", "text"] + (["audio"] if audio_features is not None else [])
    feats = [visual_features, text_features] + (
        [audio_features] if audio_features is not None else [])
    # torch semantics: mean over dim=1 only if ndim > 2 (ndim==2 behaves as L==1).
    feats = [f if f.ndim > 2 else f[:, None, :] for f in feats]
    n_mod = len(feats)

    B, _, E = feats[0].shape
    P = params["visual"]["w2"].shape[1]
    seq_lens = tuple(int(f.shape[1]) for f in feats)

    vmem_limit = _vmem_limit_bytes()
    bt, n_btiles, chunks, n_chunks = _plan_tiles(B, E, feats, vmem_limit,
                                                 max_chunk_rows)
    num_chunks = max(n_chunks)

    # ---- launch 1: streaming mean-pool (parallel batch tiles x L chunks) ---
    in_specs1 = []
    for m in range(n_mod):
        in_specs1.append(pl.BlockSpec(
            (bt, chunks[m], E),
            # Clamp the chunk index once this modality is exhausted so the
            # same block index -> no re-DMA of dead chunks.
            lambda b, l, n=n_chunks[m]: (b, jnp.minimum(l, n - 1), 0)))
    out_specs1 = tuple(pl.BlockSpec((bt, E), lambda b, l: (b, 0))
                       for _ in range(n_mod))
    out_shape1 = tuple(jax.ShapeDtypeStruct((B, E), jnp.float32)
                       for _ in range(n_mod))

    pooled = pl.pallas_call(
        functools.partial(_pool_kernel, seq_lens=seq_lens,
                          chunks=tuple(chunks), n_chunks=tuple(n_chunks)),
        out_shape=out_shape1,
        grid=(n_btiles, num_chunks),
        in_specs=in_specs1,
        out_specs=out_specs1,
        compiler_params=pltpu.CompilerParams(
            dimension_semantics=("parallel", "arbitrary"),
            vmem_limit_bytes=vmem_limit),
    )(*feats)

    # ---- launch 2: heads + similarity + loss (single grid step) ------------
    # TODO(synk): for very large E/P the head weights would need K/N tiling
    # here; they are assumed to fit comfortably in VMEM for this launch.
    temp = jnp.full((1, 1), temperature, jnp.float32)
    in_arrays = [temp] + list(pooled)
    in_specs2 = ([pl.BlockSpec(memory_space=pltpu.SMEM)] +          # temperature
                 [pl.BlockSpec((B, E), lambda i: (0, 0))] * n_mod)  # pooled
    for name in names:
        p = params[name]
        for k in ("w1", "b1", "gamma", "beta", "w2", "b2"):
            arr = p[k]
            in_arrays.append(arr)
            in_specs2.append(pl.BlockSpec(arr.shape, lambda i: (0, 0)))

    out_shape2 = tuple([jax.ShapeDtypeStruct((B, P), jnp.float32)] * n_mod +
                       [jax.ShapeDtypeStruct((B, B), jnp.float32),
                        jax.ShapeDtypeStruct((1, 1), jnp.float32)])
    out_specs2 = tuple([pl.BlockSpec((B, P), lambda i: (0, 0))] * n_mod +
                       [pl.BlockSpec((B, B), lambda i: (0, 0)),
                        pl.BlockSpec(memory_space=pltpu.SMEM)])     # scalar loss

    outs = pl.pallas_call(
        functools.partial(_heads_kernel, n_mod=n_mod, gelu_approx=gelu_approx),
        out_shape=out_shape2,
        grid=(1,),
        in_specs=in_specs2,
        out_specs=out_specs2,
        compiler_params=pltpu.CompilerParams(
            dimension_semantics=("arbitrary",),
            vmem_limit_bytes=vmem_limit),
    )(*in_arrays)

    results = {"contrastive_loss": outs[n_mod + 1][0, 0],
               "similarity_matrix": outs[n_mod]}
    if return_projections:
        results["visual_projection"] = outs[0]
        results["text_projection"] = outs[1]
        if n_mod == 3:
            results["audio_projection"] = outs[2]
    return results


# ----------------------------------------------------------------------------
# Pure-JAX f32 reference (correctness checking only)
# ----------------------------------------------------------------------------
def _reference_forward(params, visual, text, audio, temperature):
    def pool(x):
        return x.mean(axis=1) if x.ndim > 2 else x

    def head(x, p):
        h = x @ p["w1"].astype(jnp.float32) + p["b1"]
        mu = h.mean(-1, keepdims=True)
        var = ((h - mu) ** 2).mean(-1, keepdims=True)
        h = (h - mu) / jnp.sqrt(var + LN_EPS)
        h = h * p["gamma"] + p["beta"]
        h = jax.nn.gelu(h, approximate=False)
        h = h @ p["w2"].astype(jnp.float32) + p["b2"]
        n = jnp.sqrt((h * h).sum(-1, keepdims=True))
        return h / jnp.maximum(n, L2_EPS)

    vp = head(pool(visual), params["visual"])
    tp = head(pool(text), params["text"])
    ap = head(pool(audio), params["audio"]) if audio is not None else None
    sim = (vp @ tp.T) / temperature

    def ce_diag(logits):
        lse = jax.nn.logsumexp(logits, axis=-1)
        return jnp.mean(lse - jnp.diagonal(logits))

    out = {"contrastive_loss": 0.5 * (ce_diag(sim) + ce_diag(sim.T)),
           "similarity_matrix": sim,
           "visual_projection": vp, "text_projection": tp}
    if ap is not None:
        out["audio_projection"] = ap
    return out


if __name__ == "__main__":
    B, E, P = 2, 32, 128
    Lv, Lt, La = 16, 8, 12
    TEMP = 0.07

    root = jax.random.PRNGKey(0)
    kp, kv, kt, ka = jax.random.split(root, 4)
    params = init_params(kp, E, P)
    visual = jax.random.normal(kv, (B, Lv, E), jnp.float32)
    text = jax.random.normal(kt, (B, Lt, E), jnp.float32)
    audio = jax.random.normal(ka, (B, La, E), jnp.float32)

    ref = _reference_forward(params, visual, text, audio, TEMP)

    def check(out):
        assert out["similarity_matrix"].shape == (B, B)
        assert out["visual_projection"].shape == (B, P)
        assert out["text_projection"].shape == (B, P)
        assert out["audio_projection"].shape == (B, P)
        assert out["contrastive_loss"].shape == ()
        # Loose tolerances: bf16 MXU operands with f32 accumulation, and sim
        # is scaled by 1/temperature.
        assert jnp.allclose(out["visual_projection"], ref["visual_projection"],
                            atol=3e-2), "visual projection mismatch"
        assert jnp.allclose(out["text_projection"], ref["text_projection"],
                            atol=3e-2), "text projection mismatch"
        assert jnp.allclose(out["audio_projection"], ref["audio_projection"],
                            atol=3e-2), "audio projection mismatch"
        assert jnp.allclose(out["similarity_matrix"], ref["similarity_matrix"],
                            atol=0.5, rtol=5e-2), "similarity matrix mismatch"
        assert jnp.allclose(out["contrastive_loss"], ref["contrastive_loss"],
                            atol=0.3), "contrastive loss mismatch"

    # Default byte-budget plan (at these shapes: one chunk per modality).
    out = cross_modal_alignment_forward(params, visual, text, audio,
                                        temperature=TEMP,
                                        return_projections=True)
    jax.block_until_ready(out)
    check(out)

    # Forced small chunks: exercises the multi-step L pipeline, the clamped
    # index map / pl.when gating for the short (text) modality and the
    # partial-tail mask (audio, L=12 with 8-row chunks).
    out_small = cross_modal_alignment_forward(params, visual, text, audio,
                                              temperature=TEMP,
                                              return_projections=True,
                                              max_chunk_rows=8)
    jax.block_until_ready(out_small)
    check(out_small)

    print("KERNEL_OK")
</pallas_src>

<mosaic_0001>
module attributes {stable_mosaic.version = 11 : i64} {
  func.func @_pool_kernel(%arg0: i32, %arg1: i32, %arg2: memref<2x16x32xf32, #tpu.memory_space<vmem>>, %arg3: memref<2x8x32xf32, #tpu.memory_space<vmem>>, %arg4: memref<2x12x32xf32, #tpu.memory_space<vmem>>, %arg5: memref<2x32xf32, #tpu.memory_space<vmem>>, %arg6: memref<2x32xf32, #tpu.memory_space<vmem>>, %arg7: memref<2x32xf32, #tpu.memory_space<vmem>>) attributes {dimension_semantics = [#tpu.dimension_semantics<parallel>, #tpu.dimension_semantics<arbitrary>], iteration_bounds = array<i64: 1, 1>, scalar_prefetch = 0 : i64, scratch_operands = 0 : i64, tpu.core_type = #tpu.core_type<tc>, window_params = [{transform_indices = @transform_0, window_bounds = array<i64: 2, 16, 32>}, {transform_indices = @transform_1, window_bounds = array<i64: 2, 8, 32>}, {transform_indices = @transform_2, window_bounds = array<i64: 2, 12, 32>}, {transform_indices = @transform_3, window_bounds = array<i64: 2, 32>}, {transform_indices = @transform_4, window_bounds = array<i64: 2, 32>}, {transform_indices = @transform_5, window_bounds = array<i64: 2, 32>}]} {
    %c0_i32 = arith.constant 0 : i32
    %0 = arith.cmpi eq, %arg1, %c0_i32 : i32
    %1 = arith.extui %0 : i1 to i32
    %c0_i32_0 = arith.constant 0 : i32
    %2 = arith.cmpi ne, %1, %c0_i32_0 : i32
    scf.if %2 {
      %cst = arith.constant 0.000000e+00 : f32
      %21 = vector.broadcast %cst : f32 to vector<2x32xf32>
      %c0 = arith.constant 0 : index
      %c0_12 = arith.constant 0 : index
      %22 = vector.load %arg5[%c0, %c0_12] : memref<2x32xf32, #tpu.memory_space<vmem>>, vector<2x32xf32>
      tpu.vector_store %arg5[%c0, %c0_12], %21 {strides = array<i32>} : memref<2x32xf32, #tpu.memory_space<vmem>>, vector<2x32xf32>,
      %cst_13 = arith.constant 0.000000e+00 : f32
      %23 = vector.broadcast %cst_13 : f32 to vector<2x32xf32>
      %c0_14 = arith.constant 0 : index
      %c0_15 = arith.constant 0 : index
      %24 = vector.load %arg6[%c0_14, %c0_15] : memref<2x32xf32, #tpu.memory_space<vmem>>, vector<2x32xf32>
      tpu.vector_store %arg6[%c0_14, %c0_15], %23 {strides = array<i32>} : memref<2x32xf32, #tpu.memory_space<vmem>>, vector<2x32xf32>,
      %cst_16 = arith.constant 0.000000e+00 : f32
      %25 = vector.broadcast %cst_16 : f32 to vector<2x32xf32>
      %c0_17 = arith.constant 0 : index
      %c0_18 = arith.constant 0 : index
      %26 = vector.load %arg7[%c0_17, %c0_18] : memref<2x32xf32, #tpu.memory_space<vmem>>, vector<2x32xf32>
      tpu.vector_store %arg7[%c0_17, %c0_18], %25 {strides = array<i32>} : memref<2x32xf32, #tpu.memory_space<vmem>>, vector<2x32xf32>,
    } else {
    }
    %c1_i32 = arith.constant 1 : i32
    %3 = arith.cmpi slt, %arg1, %c1_i32 : i32
    %4 = arith.extui %3 : i1 to i32
    %c0_i32_1 = arith.constant 0 : i32
    %5 = arith.cmpi ne, %4, %c0_i32_1 : i32
    scf.if %5 {
      %c0 = arith.constant 0 : index
      %c0_12 = arith.constant 0 : index
      %c0_13 = arith.constant 0 : index
      %21 = vector.load %arg2[%c0, %c0_12, %c0_13] : memref<2x16x32xf32, #tpu.memory_space<vmem>>, vector<2x16x32xf32>
      %c0_14 = arith.constant 0 : index
      %c0_15 = arith.constant 0 : index
      %22 = vector.load %arg5[%c0_14, %c0_15] : memref<2x32xf32, #tpu.memory_space<vmem>>, vector<2x32xf32>
      %cst = arith.constant dense<0.000000e+00> : vector<2x32xf32>
      %23 = vector.multi_reduction <add>, %21, %cst [1] : vector<2x16x32xf32> to vector<2x32xf32>
      %24 = arith.addf %22, %23 : vector<2x32xf32>
      %c0_16 = arith.constant 0 : index
      %c0_17 = arith.constant 0 : index
      %25 = vector.load %arg5[%c0_16, %c0_17] : memref<2x32xf32, #tpu.memory_space<vmem>>, vector<2x32xf32>
      tpu.vector_store %arg5[%c0_16, %c0_17], %24 {strides = array<i32>} : memref<2x32xf32, #tpu.memory_space<vmem>>, vector<2x32xf32>,
    } else {
    }
    %c0_i32_2 = arith.constant 0 : i32
    %6 = arith.cmpi eq, %arg1, %c0_i32_2 : i32
    %7 = arith.extui %6 : i1 to i32
    %c0_i32_3 = arith.constant 0 : i32
    %8 = arith.cmpi ne, %7, %c0_i32_3 : i32
    scf.if %8 {
      %c0 = arith.constant 0 : index
      %c0_12 = arith.constant 0 : index
      %21 = vector.load %arg5[%c0, %c0_12] : memref<2x32xf32, #tpu.memory_space<vmem>>, vector<2x32xf32>
      %cst = arith.constant 6.250000e-02 : f32
      %22 = vector.broadcast %cst : f32 to vector<2x32xf32>
      %23 = arith.mulf %21, %22 : vector<2x32xf32>
      %c0_13 = arith.constant 0 : index
      %c0_14 = arith.constant 0 : index
      %24 = vector.load %arg5[%c0_13, %c0_14] : memref<2x32xf32, #tpu.memory_space<vmem>>, vector<2x32xf32>
      tpu.vector_store %arg5[%c0_13, %c0_14], %23 {strides = array<i32>} : memref<2x32xf32, #tpu.memory_space<vmem>>, vector<2x32xf32>,
    } else {
    }
    %c1_i32_4 = arith.constant 1 : i32
    %9 = arith.cmpi slt, %arg1, %c1_i32_4 : i32
    %10 = arith.extui %9 : i1 to i32
    %c0_i32_5 = arith.constant 0 : i32
    %11 = arith.cmpi ne, %10, %c0_i32_5 : i32
    scf.if %11 {
      %c0 = arith.constant 0 : index
      %c0_12 = arith.constant 0 : index
      %c0_13 = arith.constant 0 : index
      %21 = vector.load %arg3[%c0, %c0_12, %c0_13] : memref<2x8x32xf32, #tpu.memory_space<vmem>>, vector<2x8x32xf32>
      %c0_14 = arith.constant 0 : index
      %c0_15 = arith.constant 0 : index
      %22 = vector.load %arg6[%c0_14, %c0_15] : memref<2x32xf32, #tpu.memory_space<vmem>>, vector<2x32xf32>
      %cst = arith.constant dense<0.000000e+00> : vector<2x32xf32>
      %23 = vector.multi_reduction <add>, %21, %cst [1] : vector<2x8x32xf32> to vector<2x32xf32>
      %24 = arith.addf %22, %23 : vector<2x32xf32>
      %c0_16 = arith.constant 0 : index
      %c0_17 = arith.constant 0 : index
      %25 = vector.load %arg6[%c0_16, %c0_17] : memref<2x32xf32, #tpu.memory_space<vmem>>, vector<2x32xf32>
      tpu.vector_store %arg6[%c0_16, %c0_17], %24 {strides = array<i32>} : memref<2x32xf32, #tpu.memory_space<vmem>>, vector<2x32xf32>,
    } else {
    }
    %c0_i32_6 = arith.constant 0 : i32
    %12 = arith.cmpi eq, %arg1, %c0_i32_6 : i32
    %13 = arith.extui %12 : i1 to i32
    %c0_i32_7 = arith.constant 0 : i32
    %14 = arith.cmpi ne, %13, %c0_i32_7 : i32
    scf.if %14 {
      %c0 = arith.constant 0 : index
      %c0_12 = arith.constant 0 : index
      %21 = vector.load %arg6[%c0, %c0_12] : memref<2x32xf32, #tpu.memory_space<vmem>>, vector<2x32xf32>
      %cst = arith.constant 1.250000e-01 : f32
      %22 = vector.broadcast %cst : f32 to vector<2x32xf32>
      %23 = arith.mulf %21, %22 : vector<2x32xf32>
      %c0_13 = arith.constant 0 : index
      %c0_14 = arith.constant 0 : index
      %24 = vector.load %arg6[%c0_13, %c0_14] : memref<2x32xf32, #tpu.memory_space<vmem>>, vector<2x32xf32>
      tpu.vector_store %arg6[%c0_13, %c0_14], %23 {strides = array<i32>} : memref<2x32xf32, #tpu.memory_space<vmem>>, vector<2x32xf32>,
    } else {
    }
    %c1_i32_8 = arith.constant 1 : i32
    %15 = arith.cmpi slt, %arg1, %c1_i32_8 : i32
    %16 = arith.extui %15 : i1 to i32
    %c0_i32_9 = arith.constant 0 : i32
    %17 = arith.cmpi ne, %16, %c0_i32_9 : i32
    scf.if %17 {
      %c0 = arith.constant 0 : index
      %c0_12 = arith.constant 0 : index
      %c0_13 = arith.constant 0 : index
      %21 = vector.load %arg4[%c0, %c0_12, %c0_13] : memref<2x12x32xf32, #tpu.memory_space<vmem>>, vector<2x12x32xf32>
      %c0_14 = arith.constant 0 : index
      %c0_15 = arith.constant 0 : index
      %22 = vector.load %arg7[%c0_14, %c0_15] : memref<2x32xf32, #tpu.memory_space<vmem>>, vector<2x32xf32>
      %cst = arith.constant dense<0.000000e+00> : vector<2x32xf32>
      %23 = vector.multi_reduction <add>, %21, %cst [1] : vector<2x12x32xf32> to vector<2x32xf32>
      %24 = arith.addf %22, %23 : vector<2x32xf32>
      %c0_16 = arith.constant 0 : index
      %c0_17 = arith.constant 0 : index
      %25 = vector.load %arg7[%c0_16, %c0_17] : memref<2x32xf32, #tpu.memory_space<vmem>>, vector<2x32xf32>
      tpu.vector_store %arg7[%c0_16, %c0_17], %24 {strides = array<i32>} : memref<2x32xf32, #tpu.memory_space<vmem>>, vector<2x32xf32>,
    } else {
    }
    %c0_i32_10 = arith.constant 0 : i32
    %18 = arith.cmpi eq, %arg1, %c0_i32_10 : i32
    %19 = arith.extui %18 : i1 to i32
    %c0_i32_11 = arith.constant 0 : i32
    %20 = arith.cmpi ne, %19, %c0_i32_11 : i32
    scf.if %20 {
      %c0 = arith.constant 0 : index
      %c0_12 = arith.constant 0 : index
      %21 = vector.load %arg7[%c0, %c0_12] : memref<2x32xf32, #tpu.memory_space<vmem>>, vector<2x32xf32>
      %cst = arith.constant 0.0833333358 : f32
      %22 = vector.broadcast %cst : f32 to vector<2x32xf32>
      %23 = arith.mulf %21, %22 : vector<2x32xf32>
      %c0_13 = arith.constant 0 : index
      %c0_14 = arith.constant 0 : index
      %24 = vector.load %arg7[%c0_13, %c0_14] : memref<2x32xf32, #tpu.memory_space<vmem>>, vector<2x32xf32>
      tpu.vector_store %arg7[%c0_13, %c0_14], %23 {strides = array<i32>} : memref<2x32xf32, #tpu.memory_space<vmem>>, vector<2x32xf32>,
    } else {
    }
    return
  }
  func.func @transform_0(%arg0: i32, %arg1: i32) -> (i32, i32, i32) {
    %c0_i32 = arith.constant 0 : i32
    %0 = arith.minsi %arg1, %c0_i32 : i32
    %c0_i32_0 = arith.constant 0 : i32
    %c0_i32_1 = arith.constant 0 : i32
    return %arg0, %0, %c0_i32_0 : i32, i32, i32
  }
  func.func @transform_1(%arg0: i32, %arg1: i32) -> (i32, i32, i32) {
    %c0_i32 = arith.constant 0 : i32
    %0 = arith.minsi %arg1, %c0_i32 : i32
    %c0_i32_0 = arith.constant 0 : i32
    %c0_i32_1 = arith.constant 0 : i32
    return %arg0, %0, %c0_i32_0 : i32, i32, i32
  }
  func.func @transform_2(%arg0: i32, %arg1: i32) -> (i32, i32, i32) {
    %c0_i32 = arith.constant 0 : i32
    %0 = arith.minsi %arg1, %c0_i32 : i32
    %c0_i32_0 = arith.constant 0 : i32
    %c0_i32_1 = arith.constant 0 : i32
    return %arg0, %0, %c0_i32_0 : i32, i32, i32
  }
  func.func @transform_3(%arg0: i32, %arg1: i32) -> (i32, i32) {
    %c0_i32 = arith.constant 0 : i32
    %c0_i32_0 = arith.constant 0 : i32
    return %arg0, %c0_i32 : i32, i32
  }
  func.func @transform_4(%arg0: i32, %arg1: i32) -> (i32, i32) {
    %c0_i32 = arith.constant 0 : i32
    %c0_i32_0 = arith.constant 0 : i32
    return %arg0, %c0_i32 : i32, i32
  }
  func.func @transform_5(%arg0: i32, %arg1: i32) -> (i32, i32) {
    %c0_i32 = arith.constant 0 : i32
    %c0_i32_0 = arith.constant 0 : i32
    return %arg0, %c0_i32 : i32, i32
  }
}

</mosaic_0001>

<bundles_post_ra>
// kernel: tpu_custom_call.1
= control target key start
LH: loop header
LB: loop body
LE: loop exit
PB: predicated region body
PF: predicated region fallthrough
CT: control target
= control target key end

     0   :  { %11 = vsyncpa [#allocation3], 0  ;;  %vm23_vm0 = vcmask 254976   ;;  %vm36_vm1 = vcmask 261120   ;;  %v258_v2 = vmov 0.0   ;;  %vm116_vm2 = vcmask 257024   ;;  %s353_s0 = inlined_call_operand.vmem [shape: f32[2,16,32], index: 0, kind: input, shape index: {}]   ;;  %s354_s1 = inlined_call_operand.vmem [shape: f32[2,8,32], index: 1, kind: input, shape index: {}]   ;;  %s355_s2 = inlined_call_operand.vmem [shape: f32[2,12,32], index: 2, kind: input, shape index: {}]   ;;  %s356_s3 = inlined_call_operand.hbm [shape: f32[2,32], index: 3, kind: output, shape index: {0}]   ;;  %s357_s4 = inlined_call_operand.hbm [shape: f32[2,32], index: 4, kind: output, shape index: {1}]   ;;  %s358_s5 = inlined_call_operand.hbm [shape: f32[2,32], index: 5, kind: output, shape index: {2}]  }
   0x1   :  { %v73_v0 = vld [vmem:[%s354_s1] sm:$0xff]  ;;  %v74_v1 = vld [vmem:[%s354_s1 + $0x8] sm:$0xff]  ;;  %25 = vst.msk [vmem:[#allocation4] sm:$0x3] %vm23_vm0, %v258_v2  ;;  %24 = vst.msk [vmem:[#allocation2] sm:$0x3] %vm23_vm0, %v258_v2 }
   0x2   :  { %26 = vst.msk [vmem:[#allocation6] sm:$0x3] %vm23_vm0, %v258_v2  ;;  %v77_v3 = vsel %vm36_vm1, %v73_v0, 0.0  ;;  %v84_v4 = vsel %vm36_vm1, %v74_v1, 0.0  ;;  %v31_v5 = vld [vmem:[%s353_s0] sm:$0xff]  ;;  %v32_v6 = vld [vmem:[%s353_s0 + $0x8] sm:$0xff] }
   0x3   :  { %v33_v7 = vld [vmem:[%s353_s0 + $0x10] sm:$0xff]  ;;  %v78_v8 = vrot.slane %v77_v3, 4  ;;  %v85_v9 = vrot.slane %v84_v4, 4  ;;  %v34_v10 = vld [vmem:[%s353_s0 + $0x18] sm:$0xff]  ;;  %v37_v11 = vsel %vm36_vm1, %v31_v5, 0.0  ;;  %v38_v12 = vsel %vm36_vm1, %v32_v6, 0.0 }
   0x4   :  { %v109_v13 = vld [vmem:[%s355_s2] sm:$0xff]  ;;  %v39_v14 = vadd.f32 %v38_v12, %v37_v11  ;;  %v46_v15 = vsel %vm36_vm1, %v33_v7, 0.0  ;;  %v47_v16 = vsel %vm36_vm1, %v34_v10, 0.0  ;;  %v110_v17 = vld [vmem:[%s355_s2 + $0x8] sm:$0xf]  ;;  %v111_v18 = vld [vmem:[%s355_s2 + $0x10] sm:$0xff] }
   0x5   :  { %v115_v19 = vsel %vm36_vm1, %v109_v13, 0.0  ;;  %v79_v20 = vadd.f32 %v78_v8, %v77_v3  ;;  %v86_v21 = vadd.f32 %v85_v9, %v84_v4  ;;  %v48_v22 = vadd.f32 %v47_v16, %v46_v15  ;;  %v112_v23 = vld [vmem:[%s355_s2 + $0x18] sm:$0xf] }
   0x6   :  { %v117_v24 = vsel %vm116_vm2, %v110_v17, 0.0 }
   0x7   :  { %12 = vsyncpa [#allocation5], 0  ;;  %v40_v25 = vrot.slane %v39_v14, 4  ;;  %v118_v26 = vadd.f32 %v117_v24, %v115_v19  ;;  %v125_v27 = vsel %vm36_vm1, %v111_v18, 0.0  ;;  %v126_v28 = vsel %vm116_vm2, %v112_v23, 0.0  ;;  %s259_s2 = smov [#allocation4]  }
   0x8   :  { %v80_v29 = vrot.slane %v79_v20, 2  ;;  %v87_v30 = vrot.slane %v86_v21, 2  ;;  %v49_v31 = vrot.slane %v48_v22, 4  ;;  %v127_v32 = vadd.f32 %v126_v28, %v125_v27  ;;  %v75_v47 = vld [vmem:[#allocation4] sm:$0x3]  ;;  %s165_s11 = sshll.u32 %s259_s2, 4  ;;  %s166_s11 = int_to_ptr.vmem [resolvable:$true] %s165_s11 }
   0x9   :  { %v41_v33 = vadd.f32 %v40_v25, %v39_v14  ;;  %v119_v34 = vrot.slane %v118_v26, 4  ;;  %vm57_vm3 = vcmask 1041409   ;;  %v35_v60 = vld [vmem:[#allocation2] sm:$0x3]  ;;  %v113_v2 = vld [vmem:[#allocation6] sm:$0x3]  ;;  %p199_p1 = scmp.lt.s32.totalorder %s166_s11, %s166_s11 }
   0xa   :  { %v81_v35 = vadd.f32 %v80_v29, %v79_v20  ;;  %v88_v36 = vadd.f32 %v87_v30, %v86_v21  ;;  %v50_v37 = vadd.f32 %v49_v31, %v48_v22  ;;  %v128_v40 = vrot.slane %v127_v32, 4  ;;  %s260_s12 = smov [#allocation2]   ;;  %s261_s14 = smov [#allocation6]  }
   0xb   :  { %v42_v38 = vrot.slane %v41_v33, 2  ;;  %v120_v39 = vadd.f32 %v119_v34, %v118_v26  ;;  %s155_s13 = sshll.u32 %s260_s12, 4  ;;  %s175_s15 = sshll.u32 %s261_s14, 4  ;;  %s156_s13 = int_to_ptr.vmem [resolvable:$true] %s155_s13  ;;  %s176_s15 = int_to_ptr.vmem [resolvable:$true] %s175_s15 }
   0xc   :  { %v82_v41 = vrot.slane %v81_v35, 1  ;;  %v89_v42 = vrot.slane %v88_v36, 1  ;;  %v51_v43 = vrot.slane %v50_v37, 2  ;;  %v129_v46 = vadd.f32 %v128_v40, %v127_v32  ;;  %s194_s16 = scalar_lea.vmem %s166_s11, 32 }
   0xd   :  { %v43_v44 = vadd.f32 %v42_v38, %v41_v33  ;;  %v121_v45 = vrot.slane %v120_v39, 2  ;;  %p195_p0 = scmp.ne.s32.totalorder %s166_s11, %s194_s16  ;;  %p200_p2 = scmp.lt.s32.totalorder %s194_s16, %s194_s16 }
   0xe   :  { %v83_v48 = vadd.f32 %v82_v41, %v81_v35  ;;  %v90_v49 = vadd.f32 %v89_v42, %v88_v36  ;;  %v52_v50 = vadd.f32 %v51_v43, %v50_v37  ;;  %v130_v53 = vrot.slane %v129_v46, 2 }
   0xf   :  { %v44_v51 = vrot.slane %v43_v44, 1  ;;  %v122_v52 = vadd.f32 %v121_v45, %v120_v39  ;;  %p201_p3 = por %p200_p2, %p199_p1 }
  0x10   :  { %v94_v54 = vsel %vm57_vm3, %v90_v49, %v83_v48  ;;  %v53_v55 = vrot.slane %v52_v50, 1  ;;  %v131_v59 = vadd.f32 %v130_v53, %v129_v46 }
  0x11   :  { %v96_v56 = vadd.f32 %v94_v54, %v75_v47  ;;  %v45_v57 = vadd.f32 %v44_v51, %v43_v44  ;;  %v123_v58 = vrot.slane %v122_v52, 1  ;;  %p202_p4 = pnand %p201_p3, %p195_p0 }
  0x12   :  { %v54_v61 = vadd.f32 %v53_v55, %v52_v50  ;;  %v132_v63 = vrot.slane %v131_v59, 1 }
  0x13   :  { %98 = vst.msk [vmem:[#allocation4] sm:$0x3] %vm23_vm0, %v96_v56  ;;  %v124_v62 = vadd.f32 %v123_v58, %v122_v52 }
  0x14   :  { %v58_v0 = vsel %vm57_vm3, %v54_v61, %v45_v57  ;;  %v133_v3 = vadd.f32 %v132_v63, %v131_v59 }
  0x15   :  { %v60_v1 = vadd.f32 %v58_v0, %v35_v60 }
  0x16   :  { %v137_v4 = vsel %vm57_vm3, %v133_v3, %v124_v62 }
  0x17   :  { %62 = vst.msk [vmem:[#allocation2] sm:$0x3] %vm23_vm0, %v60_v1  ;;  %v139_v5 = vadd.f32 %v137_v4, %v113_v2 }
  0x19   :  { %141 = vst.msk [vmem:[#allocation6] sm:$0x3] %vm23_vm0, %v139_v5 }
  0x1a   :  { %v102_v6 = vld [vmem:[#allocation4] sm:$0x3] }
  0x1b   :  { %v103_v7 = vmul.f32 0.125, %v102_v6 }
  0x1d   :  { %105 = vst.msk [vmem:[#allocation4] sm:$0x3] %vm23_vm0, %v103_v7 }
  0x1e   :  { %v66_v8 = vld [vmem:[#allocation2] sm:$0x3] }
  0x1f   :  { %205 = shalt.err (!%p202_p4)
}
  0x20   :  { %168 = dma.vmem_to_hbm [thread:$0]  %s166_s11, 32, %s357_s4, [#allocation5]   ;;  %v67_v9 = vmul.f32 0.0625, %v66_v8  ;;  %v145_v10 = vld [vmem:[#allocation6] sm:$0x3] }
  0x21   :  { %v146_v11 = vmul.f32 0.083333336, %v145_v10  ;;  %s214_s19 = scalar_lea.vmem %s156_s13, 32  ;;  %p219_p6 = scmp.lt.s32.totalorder %s156_s13, %s156_s13 }
  0x22   :  { %69 = vst.msk [vmem:[#allocation2] sm:$0x3] %vm23_vm0, %v67_v9  ;;  %p215_p5 = scmp.ne.s32.totalorder %s156_s13, %s214_s19  ;;  %p220_p7 = scmp.lt.s32.totalorder %s214_s19, %s214_s19 }
  0x24   :  { %p221_p8 = por %p220_p7, %p219_p6 }
  0x26   :  { %p222_p9 = pnand %p221_p8, %p215_p5 }
  0x28   :  { %225 = shalt.err (!%p222_p9)
}
  0x29   :  { %158 = dma.vmem_to_hbm [thread:$0]  %s156_s13, 32, %s356_s3, [#allocation3]   ;;  %148 = vst.msk [vmem:[#allocation6] sm:$0x3] %vm23_vm0, %v146_v11 }
  0x2a   :  { %s234_s4 = scalar_lea.vmem %s176_s15, 32  ;;  %p239_p11 = scmp.lt.s32.totalorder %s176_s15, %s176_s15 }
  0x2b   :  { %p235_p10 = scmp.ne.s32.totalorder %s176_s15, %s234_s4  ;;  %p240_p12 = scmp.lt.s32.totalorder %s234_s4, %s234_s4 }
  0x2d   :  { %p241_p13 = por %p240_p12, %p239_p11 }
  0x2f   :  { %p242_p0 = pnand %p241_p13, %p235_p10 }
  0x31   :  { %245 = shalt.err (!%p242_p0)
}
  0x32   :  { %178 = dma.vmem_to_hbm [thread:$0]  %s176_s15, 32, %s358_s5, [#allocation5]  }
  0x33   :  { %254 = dma.done.wait [#allocation3], 32  }
  0x34   :  { %255 = vsyncadd [#allocation3], 4294967264 }
  0x35   :  { %256 = dma.done.wait [#allocation5], 64  }
  0x36   :  { %257 = vsyncadd [#allocation5], 4294967232 }
  0x37   :  { %188 = vsyncpa [#allocation3], 1 }
  0x38   :  { %189 = vsyncpa [#allocation5], 1 }

</bundles_post_ra>
